<compile_context>
chip_gen: v6e
topology: v6e:2x2x1
jax: 0.10.0
libtpu: 0.0.40
codegen_flags: <defaults>
</compile_context>

<pallas_src>
import jax
import jax.numpy as jnp
from jax.experimental import pallas as pl
from jax.experimental.pallas import tpu as pltpu

_LANES = 128
_F32_SUBLANES = 8


def _cdiv(a, b):
    return -(-a // b)


def _round_up(x, m):
    return ((x + m - 1) // m) * m


def _num_tensorcores():
    """2 on multi-TensorCore parts (v4 / v5p / v7x megacore), else 1."""
    try:
        kind = jax.devices()[0].device_kind.lower()
    except Exception:
        return 1
    if ("v7" in kind) or ("v4" in kind) or ("v5p" in kind):
        return 2
    return 1


def _make_kernel(has_ldj, inv_kT, sub_rows):
    def kernel(*refs):
        if has_ldj:
            p1_ref, p2_ref, ldj_ref, out_ref = refs
        else:
            p1_ref, p2_ref, out_ref = refs

        @pl.when(pl.program_id(1) == 0)
        def _():
            out_ref[...] = jnp.zeros_like(out_ref)

        # Upcast on load inside the kernel (no wrapper-side casts).
        rw = (p2_ref[...].astype(jnp.float32)
              - p1_ref[...].astype(jnp.float32)) * inv_kT
        if has_ldj:
            rw = rw - ldj_ref[...].astype(jnp.float32)

        # Fold (block_rows, 128) -> (8, 128): pure VPU adds across sublane
        # groups; no per-tile cross-lane XLU reduce.
        out_ref[...] += jnp.sum(
            rw.reshape(sub_rows, _F32_SUBLANES, _LANES), axis=0)

    return kernel


def _pallas_partial_sum(inputs, has_ldj, inv_kT, block_rows, num_par,
                        tiles_per_par):
    """Sum of the reduced work over a (num_par*tiles_per_par*block_rows, 128) slab."""
    in_spec = pl.BlockSpec((block_rows, _LANES),
                           lambda p, t: (p * tiles_per_par + t, 0))
    out_spec = pl.BlockSpec((None, _F32_SUBLANES, _LANES),
                            lambda p, t: (p, 0, 0))
    kernel = _make_kernel(has_ldj, inv_kT, block_rows // _F32_SUBLANES)

    partials = pl.pallas_call(
        kernel,
        out_shape=jax.ShapeDtypeStruct((num_par, _F32_SUBLANES, _LANES),
                                       jnp.float32),
        grid=(num_par, tiles_per_par),
        in_specs=[in_spec] * len(inputs),
        out_specs=out_spec,
        compiler_params=pltpu.CompilerParams(
            dimension_semantics=("parallel", "arbitrary"),
            vmem_limit_bytes=32 * 1024 * 1024,
            allow_input_fusion=[True] * len(inputs)),
    )(*inputs)

    # Single tiny cross-lane/sublane reduction on the (num_par, 8, 128) partials.
    return jnp.sum(partials)


def kl_div_loss(potentials1, potentials2, log_det_J=None, *, kT=1.0,
                block_rows=None, num_parallel=None, use_pallas=None):
    """Pallas implementation of KLDivLoss.forward.

    potentials1, potentials2, log_det_J: shape (batch,) arrays.
    Returns a scalar equal to mean((p2 - p1)/kT - log_det_J).
    kT must be a static Python/NumPy scalar.
    """
    assert potentials1.ndim == 1
    assert potentials1.shape == potentials2.shape
    if log_det_J is not None:
        assert log_det_J.shape == potentials1.shape

    n = potentials1.shape[0]
    has_ldj = log_det_J is not None
    arrays = [potentials1, potentials2] + ([log_det_J] if has_ldj else [])

    out_dtype = arrays[0].dtype
    for a in arrays[1:]:
        out_dtype = jnp.promote_types(out_dtype, a.dtype)

    inv_kT = 1.0 / float(kT)  # static scalar only

    def jax_sum(xs):
        rw = (xs[1].astype(jnp.float32) - xs[0].astype(jnp.float32)) * inv_kT
        if has_ldj:
            rw = rw - xs[2].astype(jnp.float32)
        return jnp.sum(rw)

    if use_pallas is None:
        # XLA already fuses (p2-p1)/kT - ldj into a roofline-speed reduce;
        # the kernel only pays off for large streams.
        use_pallas = n >= (1 << 20)
    if (not use_pallas) or n == 0:
        return (jax_sum(arrays) / max(n, 1)).astype(out_dtype)

    # ---- tiling geometry ----------------------------------------------------
    itemsizes = [jnp.dtype(a.dtype).itemsize for a in arrays]
    # Native packed tiles: f32 -> (8,128), bf16 -> (16,128), int8/fp8 -> (32,128)
    sub_mult = max(_F32_SUBLANES, 32 // min(itemsizes))

    if block_rows is None:
        # ~12 MiB of double-buffered input blocks -> 4096 rows for 3 f32 inputs.
        budget = 12 * 1024 * 1024
        bytes_per_row = sum(it * _LANES for it in itemsizes)
        block_rows = min(budget // (2 * bytes_per_row), 8192)  # v7x headroom
    block_rows = max(sub_mult, (int(block_rows) // sub_mult) * sub_mult)

    chunk = block_rows * _LANES
    if n < chunk:
        # Shrink the block so at least one full tile fits without padding.
        block_rows = max(sub_mult, ((n // _LANES) // sub_mult) * sub_mult)
        chunk = block_rows * _LANES
    num_tiles = n // chunk

    if num_tiles == 0:
        # Tiny batch forced onto the kernel path (n < sub_mult*128): one padded
        # tile. The pad is a few KiB; zeros contribute 0 to the sum and we
        # divide by the true n.
        padded = [jnp.pad(jnp.ravel(a), (0, chunk - n)).reshape(block_rows,
                                                                _LANES)
                  for a in arrays]
        total = _pallas_partial_sum(padded, has_ldj, inv_kT, block_rows,
                                    num_par=1, tiles_per_par=1)
        return (total / n).astype(out_dtype)

    # Large batch: stream whole chunks through the kernel (no pad copy); the
    # ragged remainder (< num_par*chunk elements) is reduced by plain JAX.
    num_par = num_parallel if num_parallel is not None else _num_tensorcores()
    num_par = max(1, min(int(num_par), num_tiles))
    tiles_per_par = num_tiles // num_par
    main_rows = num_par * tiles_per_par * block_rows
    main_n = main_rows * _LANES

    main = [jnp.ravel(a)[:main_n].reshape(main_rows, _LANES) for a in arrays]
    total = _pallas_partial_sum(main, has_ldj, inv_kT, block_rows,
                                num_par, tiles_per_par)
    if main_n < n:
        total = total + jax_sum([jnp.ravel(a)[main_n:] for a in arrays])
    return (total / n).astype(out_dtype)


if __name__ == "__main__":
    kT = 2.5  # thermodynamic temperature (deterministic choice)

    # --- small batch matching the module's typical use; force the Pallas path
    # so the kernel actually runs here. ---------------------------------------
    batch = 8
    k1, k2, k3 = jax.random.split(jax.random.PRNGKey(0), 3)
    potentials1 = jax.random.normal(k1, (batch,), dtype=jnp.float32) * 5.0
    potentials2 = jax.random.normal(k2, (batch,), dtype=jnp.float32) * 5.0
    log_det_J = jax.random.normal(k3, (batch,), dtype=jnp.float32)

    loss = kl_div_loss(potentials1, potentials2, log_det_J, kT=kT,
                       use_pallas=True)
    jax.block_until_ready(loss)
    ref = jnp.mean((potentials2 - potentials1) / kT - log_det_J)
    assert jnp.allclose(loss, ref, rtol=1e-5, atol=1e-5)

    loss_no_ldj = kl_div_loss(potentials1, potentials2, kT=kT,
                              use_pallas=True)
    jax.block_until_ready(loss_no_ldj)
    ref_no_ldj = jnp.mean((potentials2 - potentials1) / kT)
    assert jnp.allclose(loss_no_ldj, ref_no_ldj, rtol=1e-5, atol=1e-5)

    # --- ragged f32 batch with a deliberately small block to exercise
    # multi-tile accumulation, the (optional) core split and the JAX tail. ----
    batch2 = 5133
    kb1, kb2, kb3 = jax.random.split(jax.random.PRNGKey(0), 3)
    q1 = jax.random.normal(kb1, (batch2,), dtype=jnp.float32)
    q2 = jax.random.normal(kb2, (batch2,), dtype=jnp.float32)
    qldj = jax.random.normal(kb3, (batch2,), dtype=jnp.float32)

    loss2 = kl_div_loss(q1, q2, qldj, kT=kT, block_rows=8, use_pallas=True)
    jax.block_until_ready(loss2)
    ref2 = jnp.mean((q2 - q1) / kT - qldj)
    assert jnp.allclose(loss2, ref2, rtol=1e-4, atol=1e-4)

    # --- bf16 inputs: exercises dtype-aware (16,128) sublane rounding and the
    # in-kernel upcast (no wrapper-side casts). --------------------------------
    batch3 = 4133
    kc1, kc2, kc3 = jax.random.split(jax.random.PRNGKey(0), 3)
    r1 = jax.random.normal(kc1, (batch3,), dtype=jnp.bfloat16)
    r2 = jax.random.normal(kc2, (batch3,), dtype=jnp.bfloat16)
    rldj = jax.random.normal(kc3, (batch3,), dtype=jnp.bfloat16)

    loss3 = kl_div_loss(r1, r2, rldj, kT=kT, block_rows=8, use_pallas=True)
    jax.block_until_ready(loss3)
    ref3 = jnp.mean((r2.astype(jnp.float32) - r1.astype(jnp.float32)) / kT
                    - rldj.astype(jnp.float32))
    assert jnp.allclose(loss3.astype(jnp.float32), ref3, rtol=2e-2, atol=1e-3)

    print("KERNEL_OK")
</pallas_src>

<mosaic_0001>
module attributes {stable_mosaic.version = 11 : i64} {
  func.func @kernel(%arg0: i32, %arg1: i32, %arg2: memref<8x128xf32, #tpu.memory_space<vmem>>, %arg3: memref<8x128xf32, #tpu.memory_space<vmem>>, %arg4: memref<8x128xf32, #tpu.memory_space<vmem>>, %arg5: memref<1x8x128xf32, #tpu.memory_space<vmem>>) attributes {dimension_semantics = [#tpu.dimension_semantics<parallel>, #tpu.dimension_semantics<arbitrary>], iteration_bounds = array<i64: 1, 1>, scalar_prefetch = 0 : i64, scratch_operands = 0 : i64, tpu.core_type = #tpu.core_type<tc>, window_params = [{transform_indices = @transform_0, window_bounds = array<i64: 8, 128>}, {transform_indices = @transform_1, window_bounds = array<i64: 8, 128>}, {transform_indices = @transform_2, window_bounds = array<i64: 8, 128>}, {transform_indices = @transform_3, window_bounds = array<i64: 1, 8, 128>}]} {
    %c0_i32 = arith.constant 0 : i32
    %0 = arith.cmpi eq, %arg1, %c0_i32 : i32
    %1 = arith.extui %0 : i1 to i32
    %c0_i32_0 = arith.constant 0 : i32
    %2 = arith.cmpi ne, %1, %c0_i32_0 : i32
    scf.if %2 {
      %cst_13 = arith.constant 0.000000e+00 : f32
      %18 = vector.broadcast %cst_13 : f32 to vector<8x128xf32>
      %c0_14 = arith.constant 0 : index
      %c0_15 = arith.constant 0 : index
      %c0_16 = arith.constant 0 : index
      %19 = vector.load %arg5[%c0_14, %c0_15, %c0_16] : memref<1x8x128xf32, #tpu.memory_space<vmem>>, vector<1x8x128xf32>
      %20 = vector.shape_cast %19 : vector<1x8x128xf32> to vector<8x128xf32>
      %21 = vector.shape_cast %18 : vector<8x128xf32> to vector<1x8x128xf32>
      tpu.vector_store %arg5[%c0_14, %c0_15, %c0_16], %21 {strides = array<i32>} : memref<1x8x128xf32, #tpu.memory_space<vmem>>, vector<1x8x128xf32>,
    } else {
    }
    %c0 = arith.constant 0 : index
    %c0_1 = arith.constant 0 : index
    %3 = vector.load %arg3[%c0, %c0_1] : memref<8x128xf32, #tpu.memory_space<vmem>>, vector<8x128xf32>
    %c0_2 = arith.constant 0 : index
    %c0_3 = arith.constant 0 : index
    %4 = vector.load %arg2[%c0_2, %c0_3] : memref<8x128xf32, #tpu.memory_space<vmem>>, vector<8x128xf32>
    %5 = arith.subf %3, %4 : vector<8x128xf32>
    %cst = arith.constant 4.000000e-01 : f32
    %6 = vector.broadcast %cst : f32 to vector<8x128xf32>
    %7 = arith.mulf %5, %6 : vector<8x128xf32>
    %c0_4 = arith.constant 0 : index
    %c0_5 = arith.constant 0 : index
    %8 = vector.load %arg4[%c0_4, %c0_5] : memref<8x128xf32, #tpu.memory_space<vmem>>, vector<8x128xf32>
    %9 = arith.subf %7, %8 : vector<8x128xf32>
    %c0_6 = arith.constant 0 : index
    %c0_7 = arith.constant 0 : index
    %c0_8 = arith.constant 0 : index
    %10 = vector.load %arg5[%c0_6, %c0_7, %c0_8] : memref<1x8x128xf32, #tpu.memory_space<vmem>>, vector<1x8x128xf32>
    %11 = vector.shape_cast %10 : vector<1x8x128xf32> to vector<8x128xf32>
    %12 = vector.shape_cast %9 : vector<8x128xf32> to vector<1x8x128xf32>
    %cst_9 = arith.constant dense<0.000000e+00> : vector<8x128xf32>
    %13 = vector.multi_reduction <add>, %12, %cst_9 [0] : vector<1x8x128xf32> to vector<8x128xf32>
    %14 = arith.addf %11, %13 : vector<8x128xf32>
    %c0_10 = arith.constant 0 : index
    %c0_11 = arith.constant 0 : index
    %c0_12 = arith.constant 0 : index
    %15 = vector.load %arg5[%c0_10, %c0_11, %c0_12] : memref<1x8x128xf32, #tpu.memory_space<vmem>>, vector<1x8x128xf32>
    %16 = vector.shape_cast %15 : vector<1x8x128xf32> to vector<8x128xf32>
    %17 = vector.shape_cast %14 : vector<8x128xf32> to vector<1x8x128xf32>
    tpu.vector_store %arg5[%c0_10, %c0_11, %c0_12], %17 {strides = array<i32>} : memref<1x8x128xf32, #tpu.memory_space<vmem>>, vector<1x8x128xf32>,
    return
  }
  func.func @transform_0(%arg0: i32, %arg1: i32) -> (i32, i32) {
    %c1_i32 = arith.constant 1 : i32
    %0 = arith.muli %arg0, %c1_i32 : i32
    %1 = arith.addi %0, %arg1 : i32
    %c0_i32 = arith.constant 0 : i32
    %c0_i32_0 = arith.constant 0 : i32
    return %1, %c0_i32 : i32, i32
  }
  func.func @transform_1(%arg0: i32, %arg1: i32) -> (i32, i32) {
    %c1_i32 = arith.constant 1 : i32
    %0 = arith.muli %arg0, %c1_i32 : i32
    %1 = arith.addi %0, %arg1 : i32
    %c0_i32 = arith.constant 0 : i32
    %c0_i32_0 = arith.constant 0 : i32
    return %1, %c0_i32 : i32, i32
  }
  func.func @transform_2(%arg0: i32, %arg1: i32) -> (i32, i32) {
    %c1_i32 = arith.constant 1 : i32
    %0 = arith.muli %arg0, %c1_i32 : i32
    %1 = arith.addi %0, %arg1 : i32
    %c0_i32 = arith.constant 0 : i32
    %c0_i32_0 = arith.constant 0 : i32
    return %1, %c0_i32 : i32, i32
  }
  func.func @transform_3(%arg0: i32, %arg1: i32) -> (i32, i32, i32) {
    %c0_i32 = arith.constant 0 : i32
    %c0_i32_0 = arith.constant 0 : i32
    %c0_i32_1 = arith.constant 0 : i32
    return %arg0, %c0_i32, %c0_i32_0 : i32, i32, i32
  }
}

</mosaic_0001>

<bundles_post_ra>
// kernel: tpu_custom_call.1
= control target key start
LH: loop header
LB: loop body
LE: loop exit
PB: predicated region body
PF: predicated region fallthrough
CT: control target
= control target key end

     0   :  { %8 = vsyncpa [#allocation3], 0  ;;  %s220_s0 = inlined_call_operand.hbm [shape: f32[8,128], index: 0, kind: input, shape index: {}]   ;;  %s221_s1 = inlined_call_operand.hbm [shape: f32[8,128], index: 1, kind: input, shape index: {}]   ;;  %s222_s2 = inlined_call_operand.hbm [shape: f32[8,128], index: 2, kind: input, shape index: {}]   ;;  %s223_s3 = inlined_call_operand.hbm [shape: f32[1,8,128], index: 3, kind: output, shape index: {}]  }
   0x1   :  { %9 = vsyncpa [#allocation6], 0 }
   0x2   :  { %10 = vsyncpa [#allocation4], 0  ;;  %s184_s12 = smov [#allocation5]   ;;  %s185_s14 = smov [#allocation2]  }
   0x3   :  { %s33_s13 = sshll.u32 %s184_s12, 4  ;;  %s20_s15 = sshll.u32 %s185_s14, 4  ;;  %s34_s13 = int_to_ptr.vmem [resolvable:$true] %s33_s13  ;;  %s21_s15 = int_to_ptr.vmem [resolvable:$true] %s20_s15 }
   0x4   :  { %s106_s16 = scalar_lea.vmem %s34_s13, 128  ;;  %p111_p1 = scmp.lt.s32.totalorder %s34_s13, %s34_s13 }
   0x5   :  { %p107_p0 = scmp.ne.s32.totalorder %s34_s13, %s106_s16  ;;  %p112_p2 = scmp.lt.s32.totalorder %s106_s16, %s106_s16 }
   0x7   :  { %p113_p3 = por %p112_p2, %p111_p1 }
   0x9   :  { %p114_p4 = pnand %p113_p3, %p107_p0 }
   0xb   :  { %117 = shalt.err (!%p114_p4)
}
   0xc   :  { %36 = dma.hbm_to_vmem [thread:$0]  %s221_s1, 128, %s34_s13, [#allocation6]  }
   0xd   :  { %s126_s19 = scalar_lea.vmem %s21_s15, 128  ;;  %p131_p6 = scmp.lt.s32.totalorder %s21_s15, %s21_s15 }
   0xe   :  { %p127_p5 = scmp.ne.s32.totalorder %s21_s15, %s126_s19  ;;  %p132_p7 = scmp.lt.s32.totalorder %s126_s19, %s126_s19 }
  0x10   :  { %p133_p8 = por %p132_p7, %p131_p6 }
  0x12   :  { %p134_p9 = pnand %p133_p8, %p127_p5 }
  0x14   :  { %137 = shalt.err (!%p134_p9)
}
  0x15   :  { %23 = dma.hbm_to_vmem [thread:$0]  %s220_s0, 128, %s21_s15, [#allocation3]  }
  0x16   :  { %s186_s22 = smov [#allocation7]  }
  0x17   :  { %s46_s23 = sshll.u32 %s186_s22, 4  ;;  %s47_s23 = int_to_ptr.vmem [resolvable:$true] %s46_s23 }
  0x18   :  { %s146_s24 = scalar_lea.vmem %s47_s23, 128  ;;  %p151_p11 = scmp.lt.s32.totalorder %s47_s23, %s47_s23 }
  0x19   :  { %p147_p10 = scmp.ne.s32.totalorder %s47_s23, %s146_s24  ;;  %p152_p12 = scmp.lt.s32.totalorder %s146_s24, %s146_s24 }
  0x1b   :  { %p153_p13 = por %p152_p12, %p151_p11 }
  0x1d   :  { %p154_p0 = pnand %p153_p13, %p147_p10 }
  0x1f   :  { %157 = shalt.err (!%p154_p0)
}
  0x20   :  { %49 = dma.hbm_to_vmem [thread:$0]  %s222_s2, 128, %s47_s23, [#allocation6]  }
  0x21   :  { %178 = dma.done.wait [#allocation3], 128  }
  0x22   :  { %179 = vsyncadd [#allocation3], 4294967168 }
  0x23   :  { %180 = dma.done.wait [#allocation6], 256  }
  0x24   :  { %181 = vsyncadd [#allocation6], 4294967040  ;;  %v67_v0 = vld [vmem:[#allocation5] sm:$0xff]  ;;  %v68_v1 = vld [vmem:[#allocation2] sm:$0xff]  ;;  %s187_s0 = smov [#allocation8]  }
  0x25   :  { %v69_v2 = vsub.f32 %v67_v0, %v68_v1  ;;  %v71_v3 = vld [vmem:[#allocation7] sm:$0xff]  ;;  %s83_s26 = sshll.u32 %s187_s0, 4  ;;  %s84_s26 = int_to_ptr.vmem [resolvable:$true] %s83_s26 }
  0x26   :  { %s158_s27 = scalar_lea.vmem %s84_s26, 128  ;;  %p163_p2 = scmp.lt.s32.totalorder %s84_s26, %s84_s26 }
  0x27   :  { %v70_v4 = vmul.f32 0.4, %v69_v2  ;;  %p159_p1 = scmp.ne.s32.totalorder %s84_s26, %s158_s27  ;;  %p164_p3 = scmp.lt.s32.totalorder %s158_s27, %s158_s27 }
  0x29   :  { %v72_v5 = vsub.f32 %v70_v4, %v71_v3  ;;  %p165_p4 = por %p164_p3, %p163_p2 }
  0x2b   :  { %76 = vst [vmem:[#allocation8] sm:$0xff] %v72_v5  ;;  %p166_p5 = pnand %p165_p4, %p159_p1 }
  0x2d   :  { %169 = shalt.err (!%p166_p5)
}
  0x2e   :  { %86 = dma.vmem_to_hbm [thread:$0]  %s84_s26, 128, %s223_s3, [#allocation4]  }
  0x2f   :  { %182 = dma.done.wait [#allocation4], 128  }
  0x30   :  { %183 = vsyncadd [#allocation4], 4294967168 }
  0x31   :  { %90 = vsyncpa [#allocation3], 1 }
  0x32   :  { %91 = vsyncpa [#allocation6], 1 }
  0x33   :  { %92 = vsyncpa [#allocation4], 1 }

</bundles_post_ra>
